<compile_context>
chip_gen: v7x
topology: tpu7x:2x2x1
jax: 0.10.0
libtpu: 0.0.40
codegen_flags: <defaults>
</compile_context>

<pallas_src>
import functools

import jax
import jax.numpy as jnp
from jax.experimental import pallas as pl
from jax.experimental.pallas import tpu as pltpu


def _mcl_head_kernel(x_ref, seg_ref, bcast_ref, gamma_ref, beta_ref,
                     w_ref, b_ref, pred_ref, score_ref, *, eps, n_pred):
    # Per grid step:
    #   x_ref:     (bt, JE)          lane-dense input tile (JE = J*E)
    #   seg_ref:   (JE, J)           per-joint averaging matrix (1/E blocks)
    #   bcast_ref: (J, JE)           per-joint -> per-element broadcast matrix
    #   gamma_ref: (1, JE)           LN weight, tiled J times
    #   beta_ref:  (1, JE)           LN bias,   tiled J times
    #   w_ref:     (JE, n_pred + 1)  fused prediction/score weight
    #   b_ref:     (1, n_pred + 1)   fused bias
    #   pred_ref:  (bt, n_pred)      j-major predictions
    #   score_ref: (bt, 1)           score logits
    x = x_ref[...].astype(jnp.float32)
    seg = seg_ref[...]
    bca = bcast_ref[...]

    # LayerNorm over embed_dim (per joint), in f32.  Segment reductions and
    # broadcasts ride the MXU (idle in this HBM-bound kernel); rsqrt runs on
    # the compact (bt, J) stats on the EUP.
    mean = jnp.dot(x, seg, preferred_element_type=jnp.float32)         # (bt, J)
    xc = x - jnp.dot(mean, bca, preferred_element_type=jnp.float32)    # (bt, JE)
    var = jnp.dot(xc * xc, seg, preferred_element_type=jnp.float32)    # (bt, J)
    istd = jax.lax.rsqrt(var + eps)                                    # (bt, J)
    istd_f = jnp.dot(istd, bca, preferred_element_type=jnp.float32)    # (bt, JE)
    xn = xc * istd_f * gamma_ref[...] + beta_ref[...]                  # (bt, JE)

    # Fused heads: one lane-dense matmul yields the j-major predictions and
    # the score logit (last column) in a single (bt, n_pred + 1) slab.
    y = jnp.dot(xn, w_ref[...], preferred_element_type=jnp.float32) + b_ref[...]

    pred_ref[...] = y[:, :n_pred].astype(pred_ref.dtype)
    score_ref[...] = y[:, n_pred:].astype(score_ref.dtype)


def _round_up(a: int, m: int) -> int:
    return ((a + m - 1) // m) * m


def mcl_head_forward(x, gamma, beta, wp, bp, ws, bs, *, out_dim, eps=1e-5,
                     block_batch=1024):
    """MCLHead forward.

    x:     (B, J, E)          (batch, num_joints, embed_dim)
    gamma: (E,)   LayerNorm weight      beta: (E,)  LayerNorm bias
    wp:    (E, out_dim+1)  prediction_head weight (pre-transposed, = W.T)
    bp:    (out_dim+1,)    prediction_head bias
    ws:    (J, 1)          score_head weight (pre-transposed)
    bs:    (1,)            score_head bias
    block_batch: target batch rows per grid step.  1024 moves ~1 MiB of x per
      step and needs ~10 MiB of VMEM; up to ~2048 fits v5e/v6e/v7x with the
      48 MiB scoped-VMEM limit set below.

    Returns (prediction (B, J, out_dim), score_logit (B, 1)).
    """
    B, J, E = x.shape
    JE = J * E
    n_pred = J * out_dim
    f32 = jnp.float32

    gamma = gamma.astype(f32).reshape(E)
    beta = beta.astype(f32).reshape(E)
    wp = wp.astype(f32).reshape(E, out_dim + 1)
    bp = bp.astype(f32).reshape(out_dim + 1)
    ws_flat = ws.astype(f32).reshape(J)
    bs = bs.astype(f32).reshape(())

    # --- tiny constant operands (built once, VMEM-resident in the kernel) ---
    eye_j = jnp.eye(J, dtype=f32)
    seg = jnp.kron(eye_j, jnp.full((E, 1), 1.0 / E, f32))            # (JE, J)
    bca = jnp.kron(eye_j, jnp.ones((1, E), f32))                     # (J, JE)
    gamma_full = jnp.tile(gamma, J).reshape(1, JE)
    beta_full = jnp.tile(beta, J).reshape(1, JE)

    # Fused head weight: block-diagonal prediction part (j-major output
    # columns) plus one score column with score_head folded in:
    #   score[b] = sum_j ws[j] * (LN(x)[b,j,:] @ wp[:,-1] + bp[-1]) + bs
    w_pred = jnp.kron(eye_j, wp[:, :out_dim])                        # (JE, n_pred)
    w_score = (ws_flat[:, None] * wp[:, out_dim][None, :]).reshape(JE, 1)
    w_fused = jnp.concatenate([w_pred, w_score], axis=1)             # (JE, n_pred+1)
    b_fused = jnp.concatenate(
        [jnp.tile(bp[:out_dim], J),
         jnp.reshape(bp[out_dim] * jnp.sum(ws_flat) + bs, (1,))]
    ).reshape(1, n_pred + 1)

    # --- batch tiling: multiple-of-8 tiles, <~8 padded rows per tile, and a
    # grid of >= 2 steps so both v7x TensorCores get work. ---
    b_pad8 = _round_up(B, 8)
    n_tiles = pl.cdiv(b_pad8, block_batch)
    if n_tiles == 1 and b_pad8 >= 16:
        n_tiles = 2
    bt = _round_up(pl.cdiv(b_pad8, n_tiles), 8)
    b_pad = n_tiles * bt

    x2 = x.reshape(B, JE)                      # contiguous -> free reshape
    if b_pad != B:
        # Zero-padded rows stay finite through rsqrt(var+eps) and are sliced off.
        x2 = jnp.pad(x2, ((0, b_pad - B), (0, 0)))

    kernel = functools.partial(_mcl_head_kernel, eps=eps, n_pred=n_pred)
    itemsize = jnp.dtype(x.dtype).itemsize
    cost = pl.CostEstimate(
        flops=2 * b_pad * JE * (n_pred + 1 + 2 * J) + 8 * b_pad * JE,
        transcendentals=b_pad * J,
        bytes_accessed=(b_pad * (JE + n_pred + 1) * itemsize
                        + 4 * (JE * (n_pred + 1) + 2 * JE * J + 2 * JE + n_pred + 1)),
    )

    pred_slab, score = pl.pallas_call(
        kernel,
        out_shape=(
            jax.ShapeDtypeStruct((b_pad, n_pred), x.dtype),
            jax.ShapeDtypeStruct((b_pad, 1), x.dtype),
        ),
        grid_spec=pltpu.PrefetchScalarGridSpec(
            num_scalar_prefetch=0,
            grid=(n_tiles,),
            in_specs=[
                pl.BlockSpec((bt, JE), lambda i: (i, 0)),            # x tile
                pl.BlockSpec((JE, J), lambda i: (0, 0)),             # seg-mean
                pl.BlockSpec((J, JE), lambda i: (0, 0)),             # broadcast
                pl.BlockSpec((1, JE), lambda i: (0, 0)),             # gamma (tiled)
                pl.BlockSpec((1, JE), lambda i: (0, 0)),             # beta (tiled)
                pl.BlockSpec((JE, n_pred + 1), lambda i: (0, 0)),    # fused weight
                pl.BlockSpec((1, n_pred + 1), lambda i: (0, 0)),     # fused bias
            ],
            out_specs=(
                pl.BlockSpec((bt, n_pred), lambda i: (i, 0)),        # predictions
                pl.BlockSpec((bt, 1), lambda i: (i, 0)),             # score logits
            ),
        ),
        compiler_params=pltpu.CompilerParams(
            dimension_semantics=("parallel",),
            vmem_limit_bytes=48 * 1024 * 1024,
        ),
        cost_estimate=cost,
    )(x2, seg, bca, gamma_full, beta_full, w_fused, b_fused)

    if b_pad != B:
        pred_slab = pred_slab[:B]
        score = score[:B]
    prediction = pred_slab.reshape(B, J, out_dim)   # contiguous -> free reshape
    return prediction, score


def mcl_head_reference(x, gamma, beta, wp, bp, ws, bs, *, out_dim, eps=1e-5):
    x32 = x.astype(jnp.float32)
    mean = jnp.mean(x32, axis=-1, keepdims=True)
    var = jnp.mean((x32 - mean) ** 2, axis=-1, keepdims=True)
    xn = (x32 - mean) * jax.lax.rsqrt(var + eps) * gamma + beta
    y = xn @ wp.astype(jnp.float32) + bp.astype(jnp.float32)
    pred = y[..., :out_dim]
    score_emb = y[..., out_dim]                                   # (B, J)
    score = score_emb @ ws.reshape(-1, 1).astype(jnp.float32) + bs.reshape(1, 1)
    return pred.astype(x.dtype), score.astype(x.dtype)


if __name__ == "__main__":
    # Small shapes consistent with the module; B chosen so the grid has
    # several steps and exercises the padded-batch path.
    B, J, E, OUT = 50, 8, 32, 6      # batch, num_joints, embed_dim, out_dim

    key = jax.random.PRNGKey(0)
    k_x, k_g, k_b, k_wp, k_bp, k_ws, k_bs = jax.random.split(key, 7)

    x = jax.random.normal(k_x, (B, J, E), dtype=jnp.float32)
    gamma = 1.0 + 0.1 * jax.random.normal(k_g, (E,), dtype=jnp.float32)
    beta = 0.1 * jax.random.normal(k_b, (E,), dtype=jnp.float32)
    wp = jax.random.normal(k_wp, (E, OUT + 1), dtype=jnp.float32) * 0.05
    bp = jax.random.normal(k_bp, (OUT + 1,), dtype=jnp.float32) * 0.05
    ws = jax.random.normal(k_ws, (J, 1), dtype=jnp.float32) * 0.05
    bs = jax.random.normal(k_bs, (1,), dtype=jnp.float32) * 0.05

    pred, score = mcl_head_forward(x, gamma, beta, wp, bp, ws, bs,
                                   out_dim=OUT, block_batch=16)
    jax.block_until_ready((pred, score))

    pred_ref, score_ref = mcl_head_reference(x, gamma, beta, wp, bp, ws, bs,
                                             out_dim=OUT)

    assert pred.shape == (B, J, OUT)
    assert score.shape == (B, 1)
    # Tolerance covers MXU multi-pass f32 rounding differences vs the XLA
    # reference; real layout/weight bugs would be orders of magnitude larger.
    assert jnp.allclose(pred, pred_ref, atol=1e-3, rtol=1e-3)
    assert jnp.allclose(score, score_ref, atol=1e-3, rtol=1e-3)

    print("KERNEL_OK")
</pallas_src>

<mosaic_0001>
module attributes {stable_mosaic.version = 11 : i64} {
  func.func @_mcl_head_kernel(%arg0: i32, %arg1: memref<16x256xf32, #tpu.memory_space<vmem>>, %arg2: memref<256x8xf32, #tpu.memory_space<vmem>>, %arg3: memref<8x256xf32, #tpu.memory_space<vmem>>, %arg4: memref<1x256xf32, #tpu.memory_space<vmem>>, %arg5: memref<1x256xf32, #tpu.memory_space<vmem>>, %arg6: memref<256x49xf32, #tpu.memory_space<vmem>>, %arg7: memref<1x49xf32, #tpu.memory_space<vmem>>, %arg8: memref<16x48xf32, #tpu.memory_space<vmem>>, %arg9: memref<16x1xf32, #tpu.memory_space<vmem>>) attributes {dimension_semantics = [#tpu.dimension_semantics<parallel>], iteration_bounds = array<i64: 4>, scalar_prefetch = 0 : i64, scratch_operands = 0 : i64, tpu.core_type = #tpu.core_type<tc>, window_params = [{transform_indices = @transform_0, window_bounds = array<i64: 16, 256>}, {pipeline_mode = #tpu.pipeline_mode<synchronous>, transform_indices = @transform_1, window_bounds = array<i64: 256, 8>}, {pipeline_mode = #tpu.pipeline_mode<synchronous>, transform_indices = @transform_2, window_bounds = array<i64: 8, 256>}, {pipeline_mode = #tpu.pipeline_mode<synchronous>, transform_indices = @transform_3, window_bounds = array<i64: 1, 256>}, {pipeline_mode = #tpu.pipeline_mode<synchronous>, transform_indices = @transform_4, window_bounds = array<i64: 1, 256>}, {pipeline_mode = #tpu.pipeline_mode<synchronous>, transform_indices = @transform_5, window_bounds = array<i64: 256, 49>}, {pipeline_mode = #tpu.pipeline_mode<synchronous>, transform_indices = @transform_6, window_bounds = array<i64: 1, 49>}, {transform_indices = @transform_7, window_bounds = array<i64: 16, 48>}, {transform_indices = @transform_8, window_bounds = array<i64: 16, 1>}]} {
    %c0 = arith.constant 0 : index
    %c0_0 = arith.constant 0 : index
    %0 = vector.load %arg1[%c0, %c0_0] : memref<16x256xf32, #tpu.memory_space<vmem>>, vector<16x256xf32>
    %c0_1 = arith.constant 0 : index
    %c0_2 = arith.constant 0 : index
    %1 = vector.load %arg2[%c0_1, %c0_2] : memref<256x8xf32, #tpu.memory_space<vmem>>, vector<256x8xf32>
    %c0_3 = arith.constant 0 : index
    %c0_4 = arith.constant 0 : index
    %2 = vector.load %arg3[%c0_3, %c0_4] : memref<8x256xf32, #tpu.memory_space<vmem>>, vector<8x256xf32>
    %cst = arith.constant dense<0.000000e+00> : vector<16x8xf32>
    %3 = tpu.matmul %0, %1, %cst {dimension_numbers = #tpu.dot_dimension_numbers<[1], [0], [0], [1], [0, 0, 1, 1], [], []>} : vector<16x256xf32>, vector<256x8xf32>, vector<16x8xf32> -> vector<16x8xf32>
    %cst_5 = arith.constant dense<0.000000e+00> : vector<16x256xf32>
    %4 = tpu.matmul %3, %2, %cst_5 {dimension_numbers = #tpu.dot_dimension_numbers<[1], [0], [0], [1], [0, 0, 1, 1], [], []>} : vector<16x8xf32>, vector<8x256xf32>, vector<16x256xf32> -> vector<16x256xf32>
    %5 = arith.subf %0, %4 : vector<16x256xf32>
    %6 = arith.mulf %5, %5 : vector<16x256xf32>
    %cst_6 = arith.constant dense<0.000000e+00> : vector<16x8xf32>
    %7 = tpu.matmul %6, %1, %cst_6 {dimension_numbers = #tpu.dot_dimension_numbers<[1], [0], [0], [1], [0, 0, 1, 1], [], []>} : vector<16x256xf32>, vector<256x8xf32>, vector<16x8xf32> -> vector<16x8xf32>
    %cst_7 = arith.constant 9.99999974E-6 : f32
    %8 = vector.broadcast %cst_7 : f32 to vector<16x8xf32>
    %9 = arith.addf %7, %8 : vector<16x8xf32>
    %10 = math.rsqrt %9 : vector<16x8xf32>
    %cst_8 = arith.constant dense<0.000000e+00> : vector<16x256xf32>
    %11 = tpu.matmul %10, %2, %cst_8 {dimension_numbers = #tpu.dot_dimension_numbers<[1], [0], [0], [1], [0, 0, 1, 1], [], []>} : vector<16x8xf32>, vector<8x256xf32>, vector<16x256xf32> -> vector<16x256xf32>
    %12 = arith.mulf %5, %11 : vector<16x256xf32>
    %c0_9 = arith.constant 0 : index
    %c0_10 = arith.constant 0 : index
    %13 = vector.load %arg4[%c0_9, %c0_10] : memref<1x256xf32, #tpu.memory_space<vmem>>, vector<1x256xf32>
    %14 = vector.broadcast %13 : vector<1x256xf32> to vector<16x256xf32>
    %15 = arith.mulf %12, %14 : vector<16x256xf32>
    %c0_11 = arith.constant 0 : index
    %c0_12 = arith.constant 0 : index
    %16 = vector.load %arg5[%c0_11, %c0_12] : memref<1x256xf32, #tpu.memory_space<vmem>>, vector<1x256xf32>
    %17 = vector.broadcast %16 : vector<1x256xf32> to vector<16x256xf32>
    %18 = arith.addf %15, %17 : vector<16x256xf32>
    %c0_13 = arith.constant 0 : index
    %c0_14 = arith.constant 0 : index
    %19 = vector.load %arg6[%c0_13, %c0_14] : memref<256x49xf32, #tpu.memory_space<vmem>>, vector<256x49xf32>
    %cst_15 = arith.constant dense<0.000000e+00> : vector<16x49xf32>
    %20 = tpu.matmul %18, %19, %cst_15 {dimension_numbers = #tpu.dot_dimension_numbers<[1], [0], [0], [1], [0, 0, 1, 1], [], []>} : vector<16x256xf32>, vector<256x49xf32>, vector<16x49xf32> -> vector<16x49xf32>
    %c0_16 = arith.constant 0 : index
    %c0_17 = arith.constant 0 : index
    %21 = vector.load %arg7[%c0_16, %c0_17] : memref<1x49xf32, #tpu.memory_space<vmem>>, vector<1x49xf32>
    %22 = vector.broadcast %21 : vector<1x49xf32> to vector<16x49xf32>
    %23 = arith.addf %20, %22 : vector<16x49xf32>
    %24 = vector.extract_strided_slice %23 {offsets = [0, 0], sizes = [16, 48], strides = [1, 1]} : vector<16x49xf32> to vector<16x48xf32>
    %c0_18 = arith.constant 0 : index
    %c0_19 = arith.constant 0 : index
    %25 = vector.load %arg8[%c0_18, %c0_19] : memref<16x48xf32, #tpu.memory_space<vmem>>, vector<16x48xf32>
    tpu.vector_store %arg8[%c0_18, %c0_19], %24 {strides = array<i32>} : memref<16x48xf32, #tpu.memory_space<vmem>>, vector<16x48xf32>,
    %26 = vector.extract_strided_slice %23 {offsets = [0, 48], sizes = [16, 1], strides = [1, 1]} : vector<16x49xf32> to vector<16x1xf32>
    %c0_20 = arith.constant 0 : index
    %c0_21 = arith.constant 0 : index
    %27 = vector.load %arg9[%c0_20, %c0_21] : memref<16x1xf32, #tpu.memory_space<vmem>>, vector<16x1xf32>
    tpu.vector_store %arg9[%c0_20, %c0_21], %26 {strides = array<i32>} : memref<16x1xf32, #tpu.memory_space<vmem>>, vector<16x1xf32>,
    return
  }
  func.func @transform_0(%arg0: i32) -> (i32, i32) {
    %c0_i32 = arith.constant 0 : i32
    %c0_i32_0 = arith.constant 0 : i32
    return %arg0, %c0_i32 : i32, i32
  }
  func.func @transform_1(%arg0: i32) -> (i32, i32) {
    %c0_i32 = arith.constant 0 : i32
    %c0_i32_0 = arith.constant 0 : i32
    %c0_i32_1 = arith.constant 0 : i32
    return %c0_i32, %c0_i32_0 : i32, i32
  }
  func.func @transform_2(%arg0: i32) -> (i32, i32) {
    %c0_i32 = arith.constant 0 : i32
    %c0_i32_0 = arith.constant 0 : i32
    %c0_i32_1 = arith.constant 0 : i32
    return %c0_i32, %c0_i32_0 : i32, i32
  }
  func.func @transform_3(%arg0: i32) -> (i32, i32) {
    %c0_i32 = arith.constant 0 : i32
    %c0_i32_0 = arith.constant 0 : i32
    %c0_i32_1 = arith.constant 0 : i32
    return %c0_i32, %c0_i32_0 : i32, i32
  }
  func.func @transform_4(%arg0: i32) -> (i32, i32) {
    %c0_i32 = arith.constant 0 : i32
    %c0_i32_0 = arith.constant 0 : i32
    %c0_i32_1 = arith.constant 0 : i32
    return %c0_i32, %c0_i32_0 : i32, i32
  }
  func.func @transform_5(%arg0: i32) -> (i32, i32) {
    %c0_i32 = arith.constant 0 : i32
    %c0_i32_0 = arith.constant 0 : i32
    %c0_i32_1 = arith.constant 0 : i32
    return %c0_i32, %c0_i32_0 : i32, i32
  }
  func.func @transform_6(%arg0: i32) -> (i32, i32) {
    %c0_i32 = arith.constant 0 : i32
    %c0_i32_0 = arith.constant 0 : i32
    %c0_i32_1 = arith.constant 0 : i32
    return %c0_i32, %c0_i32_0 : i32, i32
  }
  func.func @transform_7(%arg0: i32) -> (i32, i32) {
    %c0_i32 = arith.constant 0 : i32
    %c0_i32_0 = arith.constant 0 : i32
    return %arg0, %c0_i32 : i32, i32
  }
  func.func @transform_8(%arg0: i32) -> (i32, i32) {
    %c0_i32 = arith.constant 0 : i32
    %c0_i32_0 = arith.constant 0 : i32
    return %arg0, %c0_i32 : i32, i32
  }
}

</mosaic_0001>

<bundles_post_ra>
// kernel: tpu_custom_call.1
= control target key start
LH: loop header
LB: loop body
LE: loop exit
PB: predicated region body
PF: predicated region fallthrough
CT: control target
= control target key end

     0   :  { %s1244_s27 = smov 0   ;;  %s1513_s0 = inlined_call_operand.vmem [shape: f32[64,256], index: 0, kind: input, shape index: {}]   ;;  %s1514_s1 = inlined_call_operand.vmem [shape: f32[256,8], index: 1, kind: input, shape index: {}]   ;;  %s1515_s2 = inlined_call_operand.vmem [shape: f32[8,256], index: 2, kind: input, shape index: {}]   ;;  %s1516_s3 = inlined_call_operand.vmem [shape: f32[1,256], index: 3, kind: input, shape index: {}]   ;;  %s1517_s4 = inlined_call_operand.vmem [shape: f32[1,256], index: 4, kind: input, shape index: {}]   ;;  %s1518_s5 = inlined_call_operand.vmem [shape: f32[256,49], index: 5, kind: input, shape index: {}]   ;;  %s1519_s6 = inlined_call_operand.vmem [shape: f32[1,49], index: 6, kind: input, shape index: {}]   ;;  %s1520_s7 = inlined_call_operand.vmem [shape: f32[64,48], index: 7, kind: output, shape index: {0}]   ;;  %s1521_s8 = inlined_call_operand.vmem [shape: f32[64,1], index: 8, kind: output, shape index: {1}]  }
   0x1 LB: > { %s945_s28 = sadd.s32 4294967295, %s1195_s27   ;;  %p949_p0 = scmp.ge.s32.totalorder %s1195_s27, 1  ;;  %s1195_s27 = sphi %s1244_s27, %s19_s27  }
   0x2   : > { %p267_p1 = scmp.lt.s32.totalorder %s1195_s27, 5 }
   0x4   : > { %p268_p2 = pnand %p949_p0, %p267_p1 }
   0x5   : > { %v346_v0 = vld [vmem:[%s1514_s1 + $0x80] sm:$0xff] (!%p268_p2)  ;;  %v347_v1 = vld [vmem:[%s1514_s1 + $0x88] sm:$0xff] (!%p268_p2)  ;;  %s950_s13 = sshll.u32 (!%p268_p2), %s945_s28, 1  ;;  %v348_v5 = vld [vmem:[%s1514_s1 + $0x90] sm:$0xff] (!%p268_p2)  ;;  %v1197_v54 = vmov (!%p268_p2), 0.0   ;;  %vm439_vm0 = vcmask (!%p268_p2), 64512  }
   0x6   : > { %271 = sbr.rel (%p268_p2) target bundleno = 1258 (0x4ea), region = 48  ;;  %v330_v2 = vld [vmem:[%s1514_s1] sm:$0xff] (!%p268_p2)  ;;  %v1079_v3 = vpack.c.bf16 (!%p268_p2), %v347_v1, %v346_v0  ;;  %v331_v4 = vld [vmem:[%s1514_s1 + $0x8] sm:$0xff] (!%p268_p2)  ;;  %v349_v6 = vld [vmem:[%s1514_s1 + $0x98] sm:$0xff] (!%p268_p2)  ;;  %p308_p3 = scmp.lt.s32.totalorder (!%p268_p2), %s950_s13, 7  ;;  %vm841_vm1 = vcmask (!%p268_p2), 392192  }
   0x7   : > { %v1081_v7 = vpack.c.bf16 (!%p268_p2), %v331_v4, %v330_v2  ;;  %v1083_v8 = vpack.c.bf16 (!%p268_p2), %v349_v6, %v348_v5  ;;  %v332_v9 = vld [vmem:[%s1514_s1 + $0x10] sm:$0xff] (!%p268_p2)  ;;  %v333_v10 = vld [vmem:[%s1514_s1 + $0x18] sm:$0xff] (!%p268_p2)  ;;  %v350_v11 = vld [vmem:[%s1514_s1 + $0xa0] sm:$0xff] (!%p268_p2)  ;;  %s1198_s15 = smov (!%p268_p2), 80   ;;  %vm852_vm2 = vcmask (!%p268_p2), 7168  }
   0x8   : > { %1080 = vmatprep.subr.bf16.mxu0 (!%p268_p2), %v1079_v3  ;;  %v351_v12 = vld [vmem:[%s1514_s1 + $0xa8] sm:$0xff] (!%p268_p2)  ;;  %1112 = vmatprep.subr.bf16.mxu1 (!%p268_p2), %v1079_v3  ;;  %v1085_v13 = vpack.c.bf16 (!%p268_p2), %v333_v10, %v332_v9  ;;  %v334_v15 = vld [vmem:[%s1514_s1 + $0x20] sm:$0xff] (!%p268_p2)  ;;  %v352_v17 = vld [vmem:[%s1514_s1 + $0xb0] sm:$0xff] (!%p268_p2) }
   0x9   : > { %1082 = vmatpush3.bf16.msra.mxu0 (!%p268_p2), %v1081_v7  ;;  %1114 = vmatpush3.bf16.msra.mxu1 (!%p268_p2), %v1081_v7  ;;  %v1087_v14 = vpack.c.bf16 (!%p268_p2), %v351_v12, %v350_v11  ;;  %v335_v16 = vld [vmem:[%s1514_s1 + $0x28] sm:$0xff] (!%p268_p2)  ;;  %v353_v18 = vld [vmem:[%s1514_s1 + $0xb8] sm:$0xff] (!%p268_p2)  ;;  %v336_v21 = vld [vmem:[%s1514_s1 + $0x30] sm:$0xff] (!%p268_p2) }
   0xa   : > { %1084 = vmatprep.subr.bf16.mxu0 (!%p268_p2), %v1083_v8  ;;  %1116 = vmatprep.subr.bf16.mxu1 (!%p268_p2), %v1083_v8  ;;  %v1089_v19 = vpack.c.bf16 (!%p268_p2), %v335_v16, %v334_v15  ;;  %v1091_v20 = vpack.c.bf16 (!%p268_p2), %v353_v18, %v352_v17  ;;  %v337_v22 = vld [vmem:[%s1514_s1 + $0x38] sm:$0xff] (!%p268_p2)  ;;  %v354_v23 = vld [vmem:[%s1514_s1 + $0xc0] sm:$0xff] (!%p268_p2)  ;;  %v355_v24 = vld [vmem:[%s1514_s1 + $0xc8] sm:$0xff] (!%p268_p2) }
   0xb   : > { %v1093_v26 = vpack.c.bf16 (!%p268_p2), %v337_v22, %v336_v21  ;;  %v1095_v27 = vpack.c.bf16 (!%p268_p2), %v355_v24, %v354_v23  ;;  %v338_v28 = vld [vmem:[%s1514_s1 + $0x40] sm:$0xff] (!%p268_p2)  ;;  %v339_v29 = vld [vmem:[%s1514_s1 + $0x48] sm:$0xff] (!%p268_p2)  ;;  %v356_v30 = vld [vmem:[%s1514_s1 + $0xd0] sm:$0xff] (!%p268_p2) }
   0xc   : > { %v357_v31 = vld [vmem:[%s1514_s1 + $0xd8] sm:$0xff] (!%p268_p2)  ;;  %v1097_v32 = vpack.c.bf16 (!%p268_p2), %v339_v29, %v338_v28  ;;  %v340_v34 = vld [vmem:[%s1514_s1 + $0x50] sm:$0xff] (!%p268_p2)  ;;  %v358_v36 = vld [vmem:[%s1514_s1 + $0xe0] sm:$0xff] (!%p268_p2) }
   0xd   : > { %s1523_s13 = smov (!%p308_p3, %s950_s13), 7  ;;  %1086 = vmatpush3.bf16.msra.mxu0 %v1085_v13  ;;  %1118 = vmatpush3.bf16.msra.mxu1 %v1085_v13  ;;  %v1099_v33 = vpack.c.bf16 %v357_v31, %v356_v30  ;;  %v341_v35 = vld [vmem:[%s1514_s1 + $0x58] sm:$0xff]  ;;  %v359_v37 = vld [vmem:[%s1514_s1 + $0xe8] sm:$0xff]  ;;  %v342_v40 = vld [vmem:[%s1514_s1 + $0x60] sm:$0xff] }
   0xe   : > { %s964_s11 = sshll.u32 %s1523_s13, 4  ;;  %1088 = vmatprep.subr.bf16.mxu0 %v1087_v14  ;;  %1120 = vmatprep.subr.bf16.mxu1 %v1087_v14  ;;  %v1101_v38 = vpack.c.bf16 %v341_v35, %v340_v34  ;;  %v1103_v39 = vpack.c.bf16 %v359_v37, %v358_v36  ;;  %v343_v41 = vld [vmem:[%s1514_s1 + $0x68] sm:$0xff]  ;;  %v360_v42 = vld [vmem:[%s1514_s1 + $0xf0] sm:$0xff]  ;;  %v361_v43 = vld [vmem:[%s1514_s1 + $0xf8] sm:$0xff]  ;;  %s954_s30 = sshll.u32 %s1523_s13, 3 }
   0xf   : > { %s1300_s19 = scalar_lea.vmem %s1513_s0, %s964_s11  ;;  %v1105_v44 = vpack.c.bf16 %v343_v41, %v342_v40  ;;  %v1107_v45 = vpack.c.bf16 %v361_v43, %v360_v42  ;;  %v344_v46 = vld [vmem:[%s1514_s1 + $0x70] sm:$0xff]  ;;  %v345_v47 = vld [vmem:[%s1514_s1 + $0x78] sm:$0xff]  ;;  %v363_v49 = vld [vmem:[%s1515_s2 + $0x8] sm:$0xff]  ;;  %s318_s14 = scalar_lea.vmem %s1520_s7, %s954_s30 }
  0x10   : > { %v1315_v25 = vld [vmem:[%s1300_s19 + $0x8] sm:$0xff]  ;;  %v1109_v48 = vpack.c.bf16 %v345_v47, %v344_v46  ;;  %v326_v50 = vld [vmem:[%s1300_s19] sm:$0xff]  ;;  %v329_v51 = vld [vmem:[%s1300_s19 + $0x18] sm:$0xff]  ;;  %s324_s17 = scalar_lea.vmem %s1521_s8, %s954_s30 }
  0x11   : > { %428 = vmatprep.mubr.f32.mxu0 %v1315_v25  ;;  %1090 = vmatpush3.bf16.msra.mxu0 %v1089_v19  ;;  %v362_v52 = vld [vmem:[%s1515_s2] sm:$0xff]  ;;  %v328_v53 = vld [vmem:[%s1300_s19 + $0x10] sm:$0xff]  ;;  %v744_v10 = vld [vmem:[%s1518_s5 + $0x88] sm:$0xff] }
  0x12   : > { %1122 = vmatpush3.bf16.msra.mxu1 %v1089_v19  ;;  %1092 = vmatprep.subr.bf16.mxu0 %v1091_v20  ;;  %v743_v9 = vld [vmem:[%s1518_s5 + $0x80] sm:$0xff]  ;;  %v728_v13 = vld [vmem:[%s1518_s5 + $0x8] sm:$0xff]  ;;  %v745_v14 = vld [vmem:[%s1518_s5 + $0x90] sm:$0xff] }
  0x13   : > { %1124 = vmatprep.subr.bf16.mxu1 %v1091_v20  ;;  %v727_v11 = vld [vmem:[%s1518_s5] sm:$0xff]  ;;  %v1143_v12 = vpack.c.bf16 %v744_v10, %v743_v9  ;;  %v746_v15 = vld [vmem:[%s1518_s5 + $0x98] sm:$0xff]  ;;  %v729_v18 = vld [vmem:[%s1518_s5 + $0x10] sm:$0xff] }
  0x14   : > { %v1145_v16 = vpack.c.bf16 %v728_v13, %v727_v11  ;;  %v1147_v17 = vpack.c.bf16 %v746_v15, %v745_v14  ;;  %v730_v19 = vld [vmem:[%s1518_s5 + $0x18] sm:$0xff]  ;;  %v747_v20 = vld [vmem:[%s1518_s5 + $0xa0] sm:$0xff]  ;;  %v748_v21 = vld [vmem:[%s1518_s5 + $0xa8] sm:$0xff] }
  0x15   : > { %1094 = vmatpush3.bf16.msra.mxu0 %v1093_v26  ;;  %v1149_v22 = vpack.c.bf16 %v730_v19, %v729_v18  ;;  %v1151_v23 = vpack.c.bf16 %v748_v21, %v747_v20  ;;  %v731_v24 = vld [vmem:[%s1518_s5 + $0x20] sm:$0xff]  ;;  %v733_v30 = vld [vmem:[%s1518_s5 + $0x30] sm:$0xff]  ;;  %v734_v31 = vld [vmem:[%s1518_s5 + $0x38] sm:$0xff] }
  0x16   : > { %1126 = vmatpush3.bf16.msra.mxu1 %v1093_v26  ;;  %1096 = vmatprep.subr.bf16.mxu0 %v1095_v27  ;;  %v749_v26 = vld [vmem:[%s1518_s5 + $0xb0] sm:$0xff]  ;;  %v1157_v34 = vpack.c.bf16 %v734_v31, %v733_v30  ;;  %v735_v36 = vld [vmem:[%s1518_s5 + $0x40] sm:$0xff]  ;;  %v736_v37 = vld [vmem:[%s1518_s5 + $0x48] sm:$0xff] }
  0x17   : > { %1128 = vmatprep.subr.bf16.mxu1 %v1095_v27  ;;  %v750_v27 = vld [vmem:[%s1518_s5 + $0xb8] sm:$0xff]  ;;  %v1161_v40 = vpack.c.bf16 %v736_v37, %v735_v36  ;;  %v737_v42 = vld [vmem:[%s1518_s5 + $0x50] sm:$0xff]  ;;  %v695_v10 = vld [vmem:[%s1516_s3] sm:$0x3] }
  0x18   : > { %v1155_v29 = vpack.c.bf16 %v750_v27, %v749_v26  ;;  %v738_v43 = vld [vmem:[%s1518_s5 + $0x58] sm:$0xff]  ;;  %v711_v13 = vld [vmem:[%s1517_s4] sm:$0x3] }
  0x19   : > { %1098 = vmatpush3.bf16.msra.mxu0 %v1097_v32 }
  0x1a   : > { %1130 = vmatpush3.bf16.msra.mxu1 %v1097_v32  ;;  %1100 = vmatprep.subr.bf16.mxu0 %v1099_v33  ;;  %v751_v32 = vld [vmem:[%s1518_s5 + $0xc0] sm:$0xff] }
  0x1b   : > { %1132 = vmatprep.subr.bf16.mxu1 %v1099_v33  ;;  %v752_v33 = vld [vmem:[%s1518_s5 + $0xc8] sm:$0xff] }
  0x1c   : > { %v1159_v35 = vpack.c.bf16 %v752_v33, %v751_v32 }
  0x1d   : > { %1102 = vmatpush3.bf16.msra.mxu0 %v1101_v38 }
  0x1e   : > { %1134 = vmatpush3.bf16.msra.mxu1 %v1101_v38  ;;  %1104 = vmatprep.subr.bf16.mxu0 %v1103_v39  ;;  %v753_v38 = vld [vmem:[%s1518_s5 + $0xd0] sm:$0xff] }
  0x1f   : > { %1136 = vmatprep.subr.bf16.mxu1 %v1103_v39  ;;  %v754_v39 = vld [vmem:[%s1518_s5 + $0xd8] sm:$0xff] }
  0x20   : > { %v1163_v41 = vpack.c.bf16 %v754_v39, %v753_v38 }
  0x21   : > { %1106 = vmatpush3.bf16.msra.mxu0 %v1105_v44 }
  0x22   : > { %1138 = vmatpush3.bf16.msra.mxu1 %v1105_v44  ;;  %1108 = vmatprep.subr.bf16.mxu0 %v1107_v45  ;;  %v1165_v44 = vpack.c.bf16 %v738_v43, %v737_v42 }
  0x23   : > { %1140 = vmatprep.subr.bf16.mxu1 %v1107_v45 }
  0x25   : > { %1110 = vmatpush3.bf16.msra.mxu0 %v1109_v48 }
  0x26   : > { %1142 = vmatpush3.bf16.msra.mxu1 %v1109_v48  ;;  %446 = vmatprep.subr.mxu0 %v363_v49 }
  0x27   : > { %1144 = vmatprep.subr.bf16.mxu1 %v1143_v12 }
  0x28   : > { %429 = vmatmul.mubr.f32.vlgmr.msra.gmra.mrb[0].mxu0 %v326_v50 }
  0x29   : > { %433 = vmatprep.mubr.f32.mxu0 %v329_v51  ;;  %447 = vmatpush1.msra.mxu0 %v362_v52 }
  0x2a   : > { %614 = vmatprep.subr.mxu0 %v363_v49 }
  0x2c   : > { %434 = vmatmul.mubr.f32.gmra.mrb[2].mxu0 %v328_v53 }
  0x2d   : > { %510 = vmatprep.mubr.f32.mxu0 %v1197_v54 }
  0xfb   : > { %v997_v55 = vpop.f32.mrb[0].mxu0 }
  0xfc   : > { %v998_v56 = vpop.f32.mrb[1].mxu0 }
  0xfd   : > { %v999_v57 = vadd.f32 %v998_v56, %v997_v55  ;;  %v755_v56 = vld [vmem:[%s1518_s5 + $0xe0] sm:$0xff] }
  0xff   : > { %v1000_v58 = vpop.f32.mrb[2].mxu0  ;;  %957 = vmatmul.mubr.msk.f32.vlgmr.msra.gmra.mrb[4].mxu0 %vm439_vm0, %v999_v57  ;;  %v756_v57 = vld [vmem:[%s1518_s5 + $0xe8] sm:$0xff] }
 0x100   : > { %v1001_v59 = vpop.f32.mrb[3].mxu0  ;;  %516 = vmatprep.mubr.f32.mxu0 %v1197_v54  ;;  %615 = vmatpush1.msra.mxu0 %v362_v52 }
 0x101   : > { %v1002_v60 = vadd.f32 %v1001_v59, %v1000_v58  ;;  %v1167_v58 = vpack.c.bf16 %v756_v57, %v755_v56  ;;  %v739_v59 = vld [vmem:[%s1518_s5 + $0x60] sm:$0xff] }
 0x103   : > { %958 = vmatmul.mubr.msk.f32.gmra.mrb[6].mxu0 %vm439_vm0, %v1002_v60 }
 0x104   : > { %678 = vmatprep.mubr.f32.mxu0 %v1197_v54 }
 0x1d2   : > { %v512_v61 = vpop.f32.mrb[4].mxu0 }
 0x1d3   : > { %v1374_v62 = vsub.f32 %v326_v50, %v512_v61  ;;  %v514_v63 = vpop.f32.mrb[5].mxu0  ;;  %v757_v61 = vld [vmem:[%s1518_s5 + $0xf0] sm:$0xff] }
 0x1d4   : > { %v1377_v0 = vsub.f32 %v1315_v25, %v514_v63  ;;  %v732_v25 = vld [vmem:[%s1518_s5 + $0x28] sm:$0xff]  ;;  %v758_v63 = vld [vmem:[%s1518_s5 + $0xf8] sm:$0xff] }
 0x1d5   : > { %v527_v3 = vmul.f32 %v1374_v62, %v1374_v62  ;;  %v1153_v28 = vpack.c.bf16 %v732_v25, %v731_v24 }
 0x1d6   : > { %v518_v1 = vpop.f32.mrb[6].mxu0  ;;  %v528_v2 = vmul.f32 %v1377_v0, %v1377_v0 }
 0x1d7   : > { %v1383_v4 = vsub.f32 %v328_v53, %v518_v1  ;;  %v520_v5 = vpop.f32.mrb[7].mxu0  ;;  %v1171_v1 = vpack.c.bf16 %v758_v63, %v757_v61 }
 0x1d8   : > { %v1385_v6 = vsub.f32 %v329_v51, %v520_v5  ;;  %595 = vmatprep.mubr.f32.mxu1 %v528_v2  ;;  %v741_v2 = vld [vmem:[%s1518_s5 + $0x70] sm:$0xff] }
 0x1d9   : > { %596 = vmatmul.mubr.f32.vlgmr.msra.gmra.mrb[0].mxu1 %v527_v3  ;;  %v529_v8 = vmul.f32 %v1383_v4, %v1383_v4  ;;  %v742_v3 = vld [vmem:[%s1518_s5 + $0x78] sm:$0xff] }
 0x1da   : > { %v530_v7 = vmul.f32 %v1385_v6, %v1385_v6  ;;  %1146 = vmatpush3.bf16.msra.mxu1 %v1145_v16  ;;  %v1173_v5 = vpack.c.bf16 %v742_v3, %v741_v2 }
 0x1db   : > { %1148 = vmatprep.subr.bf16.mxu1 %v1147_v17 }
 0x1dc   : > { %600 = vmatprep.mubr.f32.mxu1 %v530_v7  ;;  %v697_v7 = vlaneseq }
 0x1dd   : > { %601 = vmatmul.mubr.f32.gmra.mrb[2].mxu1 %v529_v8 }
 0x1de   : > { %1150 = vmatpush3.bf16.msra.mxu1 %v1149_v22  ;;  %v698_v8 = vshrl.u32 %v697_v7, 7 }
 0x1df   : > { %1152 = vmatprep.subr.bf16.mxu1 %v1151_v23 }
 0x1e0   : > { %v699_v9 = vsub.s32 0, %v698_v8  ;;  %v703_v11 = vsub.s32 1, %v698_v8 }
 0x1e2   : > { %1154 = vmatpush3.bf16.msra.mxu1 %v1153_v28  ;;  %v700_v12 = vrot.slane %v695_v10, %v699_v9  ;;  %v704_v15 = vrot.slane %v695_v10, %v703_v11  ;;  %v720_v19 = vrot.slane %v711_v13, %v703_v11  ;;  %v716_v21 = vrot.slane %v711_v13, %v699_v9 }
 0x1e3   : > { %1156 = vmatprep.subr.bf16.mxu1 %v1155_v29 }
 0x1e6   : > { %1158 = vmatpush3.bf16.msra.mxu1 %v1157_v34 }
 0x1e7   : > { %1160 = vmatprep.subr.bf16.mxu1 %v1159_v35 }
 0x1ea   : > { %1162 = vmatpush3.bf16.msra.mxu1 %v1161_v40 }
 0x1eb   : > { %1164 = vmatprep.subr.bf16.mxu1 %v1163_v41 }
 0x1ee   : > { %1166 = vmatpush3.bf16.msra.mxu1 %v1165_v44 }
 0x1ef   : > { %1168 = vmatprep.subr.bf16.mxu1 %v1167_v58 }
 0x2ac   : > { %v1035_v45 = vpop.f32.mrb[0].mxu1 }
 0x2ad   : > { %v1036_v46 = vpop.f32.mrb[1].mxu1 }
 0x2ae   : > { %v1037_v47 = vadd.f32 %v1036_v46, %v1035_v45 }
 0x2b0   : > { %v598_v48 = vadd.f32 1e-05, %v1037_v47  ;;  %v1038_v49 = vpop.f32.mrb[2].mxu1 }
 0x2b1   : > { %v1039_v50 = vpop.f32.mrb[3].mxu1 }
 0x2b2   : > { %1185 = vrsqrt.f32 %v598_v48  ;;  %v1040_v51 = vadd.f32 %v1039_v50, %v1038_v49 }
 0x2b4   : > { %v603_v52 = vadd.f32 1e-05, %v1040_v51 }
 0x2b6   : > { %1187 = vrsqrt.f32 %v603_v52 }
 0x2bc   : > { %v1186_v53 = vpop.eup %1185 }
 0x2bd   : > { %959 = vmatmul.mubr.msk.f32.vlgmr.msra.gmra.mrb[8].mxu0 %vm439_vm0, %v1186_v53 }
 0x2be   : > { %684 = vmatprep.mubr.f32.mxu0 %v1197_v54  ;;  %v740_v54 = vld [vmem:[%s1518_s5 + $0x68] sm:$0xff] }
 0x2bf   : > { %v1169_v60 = vpack.c.bf16 %v740_v54, %v739_v59 }
 0x2c0   : > { %v1188_v55 = vpop.eup %1187 }
 0x2c1   : > { %960 = vmatmul.mubr.msk.f32.gmra.mrb[10].mxu0 %vm439_vm0, %v1188_v55  ;;  %1170 = vmatpush3.bf16.msra.mxu1 %v1169_v60 }
 0x2c2   : > { %1172 = vmatprep.subr.bf16.mxu1 %v1171_v1 }
 0x2c5   : > { %1174 = vmatpush3.bf16.msra.mxu1 %v1173_v5 }
 0x390   : > { %v680_v14 = vpop.f32.mrb[8].mxu0 }
 0x391   : > { %v691_v16 = vmul.f32 %v680_v14, %v1374_v62  ;;  %v682_v17 = vpop.f32.mrb[9].mxu0 }
 0x392   : > { %v692_v18 = vmul.f32 %v682_v17, %v1377_v0 }
 0x393   : > { %v707_v20 = vmul.f32 %v700_v12, %v691_v16 }
 0x394   : > { %v708_v22 = vmul.f32 %v704_v15, %v692_v18  ;;  %v686_v23 = vpop.f32.mrb[10].mxu0 }
 0x395   : > { %v693_v24 = vmul.f32 %v686_v23, %v1383_v4  ;;  %v688_v25 = vpop.f32.mrb[11].mxu0  ;;  %v723_v28 = vadd.f32 %v716_v21, %v707_v20  ;;  %v961_v4 = vld [vmem:[%s1519_s6] ss:$0 sm:$0xff] }
 0x396   : > { %v694_v26 = vmul.f32 %v688_v25, %v1385_v6  ;;  %v724_v27 = vadd.f32 %v720_v19, %v708_v22 }
 0x397   : > { %v709_v29 = vmul.f32 %v700_v12, %v693_v24 }
 0x398   : > { %v710_v30 = vmul.f32 %v704_v15, %v694_v26  ;;  %830 = vmatprep.mubr.f32.mxu1 %v724_v27 }
 0x399   : > { %831 = vmatmul.mubr.f32.vlgmr.msra.gmra.mrb[4].mxu1 %v723_v28  ;;  %v725_v31 = vadd.f32 %v716_v21, %v709_v29 }
 0x39a   : > { %v726_v62 = vadd.f32 %v720_v19, %v710_v30 }
 0x39c   : > { %835 = vmatprep.mubr.f32.mxu1 %v726_v62 }
 0x39d   : > { %836 = vmatmul.mubr.f32.gmra.mrb[6].mxu1 %v725_v31 }
 0x46c   : > { %v1073_v0 = vpop.f32.mrb[4].mxu1 }
 0x46d   : > { %v1074_v32 = vpop.f32.mrb[5].mxu1 }
 0x46e   : > { %v1075_v33 = vadd.f32 %v1074_v32, %v1073_v0 }
 0x470   : > { %v1076_v6 = vpop.f32.mrb[6].mxu1  ;;  %v833_v34 = vadd.f32 %v1075_v33, %v961_v4 }
 0x471   : > { %v1077_v35 = vpop.f32.mrb[7].mxu1 }
 0x472   : > { %v1078_v36 = vadd.f32 %v1077_v35, %v1076_v6  ;;  %846 = vrot.lane.b32.xlu0 %v833_v34, %s1198_s15  ;;  %842 = vst.msk [vmem:[%s318_s14] sm:$0xff] %vm841_vm1, %v833_v34 }
 0x474   : > { %v838_v37 = vadd.f32 %v1078_v36, %v961_v4 }
 0x476   : > { %848 = vrot.lane.b32.xlu0 %v838_v37, %s1198_s15  ;;  %843 = vst.msk [vmem:[%s318_s14 + $0x8] sm:$0xff] %vm841_vm1, %v838_v37 }
 0x4e4   : > { %v847_v38 = vpop.permute.xlu0 %846 }
 0x4e5   : > { %853 = vst.msk [vmem:[%s324_s17] sm:$0xff] %vm852_vm2, %v847_v38 }
 0x4e8   : > { %v849_v39 = vpop.permute.xlu0 %848 }
 0x4e9   : > { %854 = vst.msk [vmem:[%s324_s17 + $0x8] sm:$0xff] %vm852_vm2, %v849_v39 }
 0x4ea PF: > { %s19_s27 = sadd.s32 1, %s1195_s27  }
 0x4eb   : > { %p16_p4 = scmp.ge.s32.totalorder %s19_s27, 6  }
 0x4ed   :  { %18 = sbr.rel (!%p16_p4) target bundleno = 1 (0x1), region = 90 }

</bundles_post_ra>
